<compile_context>
chip_gen: v5e
topology: v5e:2x2
jax: 0.10.0
libtpu: 0.0.40
codegen_flags: <defaults>
</compile_context>

<pallas_src>
import functools

import jax
import jax.numpy as jnp
from jax.experimental import pallas as pl
from jax.experimental.pallas import tpu as pltpu


def _ls_ce_kernel(x_ref, lbl_ref, loss_ref, valid_ref,
                  *, lb_pos, lb_neg, ignore_index, hw):
    t = pl.program_id(1)

    # Per-batch accumulator init (pixel-tile axis is the revisit axis).
    @pl.when(t == 0)
    def _():
        loss_ref[...] = jnp.zeros_like(loss_ref)
        valid_ref[...] = jnp.zeros_like(valid_ref)

    x = x_ref[0].astype(jnp.float32)        # (C, tile)  classes on sublanes
    lbl = lbl_ref[0]                        # (1, tile)  int32, pixels on lanes
    num_classes, tile = x.shape

    # Pixel validity: inside the real H*W extent and not ignore_index.
    col = jax.lax.broadcasted_iota(jnp.int32, (1, tile), 1)
    in_bounds = (col + t * tile) < hw
    valid = jnp.logical_and(in_bounds, lbl != ignore_index)   # (1, tile)

    # Numerically stable log-softmax over the class (sublane) axis.
    m = jnp.max(x, axis=0, keepdims=True)                     # (1, tile)
    z = x - m                                                  # (C, tile)
    lse = jnp.log(jnp.sum(jnp.exp(z), axis=0, keepdims=True))  # (1, tile)
    sum_z = jnp.sum(z, axis=0, keepdims=True)                  # (1, tile)

    # z at the true class (ignored / out-of-bounds pixels are masked below,
    # so no label clamping is needed).
    class_ids = jax.lax.broadcasted_iota(jnp.int32, (num_classes, tile), 0)
    z_lbl = jnp.sum(jnp.where(class_ids == lbl, z, 0.0),
                    axis=0, keepdims=True)                     # (1, tile)

    # loss = -sum_c smooth_c * (z_c - lse)
    loss = (lb_neg * (num_classes * lse - sum_z)
            + (lb_pos - lb_neg) * (lse - z_lbl))               # (1, tile)
    loss = jnp.where(valid, loss, 0.0)

    # Lane-wise accumulation (no per-step cross-lane reduce, no scalar RMW).
    loss_ref[0] += loss
    valid_ref[0] += valid.astype(jnp.float32)


def _choose_tile_hw(hw, c, itemsize, *, target_block_bytes=256 * 1024,
                    max_tile=16 * 1024):
    """Largest lane-multiple pixel tile with a ~256 KiB logits block.

    Conservative enough to fit double-buffered inputs + compiler temporaries
    within 32 MiB scoped VMEM on v5e/v6e/v7x.
    """
    tile = (target_block_bytes // max(1, c * itemsize)) // 128 * 128
    tile = max(128, min(int(tile), max_tile))
    if tile >= hw:
        return int(hw)          # single full-extent tile per image (always legal)
    return int(tile)


def label_smooth_softmax_ce(logits, label, *, lb_smooth=0.1,
                            reduction="mean", ignore_index=-100,
                            tile_hw=None):
    """Matches LabelSmoothSoftmaxCEV1.forward.

    logits: (N, C, H, W) float (f32 or bf16; cast to f32 inside the kernel)
    label:  (N, H, W) integer labels, ignore_index marks ignored pixels
    """
    N, C, H, W = logits.shape
    HW = H * W

    # Free views of the contiguous NCHW input: no transpose / pad / upcast
    # copies of the logits in HBM.  The label cast/reshape is negligible.
    x = logits.reshape(N, C, HW)
    lbl = label.reshape(N, 1, HW).astype(jnp.int32)

    if tile_hw is None:
        tile_hw = _choose_tile_hw(HW, C, x.dtype.itemsize)
    num_tiles = pl.cdiv(HW, tile_hw)

    lb_pos = 1.0 - lb_smooth
    lb_neg = lb_smooth / C

    kernel = functools.partial(_ls_ce_kernel, lb_pos=lb_pos, lb_neg=lb_neg,
                               ignore_index=ignore_index, hw=HW)

    out_shape = (jax.ShapeDtypeStruct((N, 1, tile_hw), jnp.float32),
                 jax.ShapeDtypeStruct((N, 1, tile_hw), jnp.float32))

    loss_part, valid_part = pl.pallas_call(
        kernel,
        out_shape=out_shape,
        grid_spec=pltpu.PrefetchScalarGridSpec(
            num_scalar_prefetch=0,
            grid=(N, num_tiles),
            in_specs=[
                pl.BlockSpec((1, C, tile_hw), lambda n, t: (n, 0, t)),
                pl.BlockSpec((1, 1, tile_hw), lambda n, t: (n, 0, t)),
            ],
            out_specs=[
                pl.BlockSpec((1, 1, tile_hw), lambda n, t: (n, 0, 0)),
                pl.BlockSpec((1, 1, tile_hw), lambda n, t: (n, 0, 0)),
            ],
        ),
        compiler_params=pltpu.CompilerParams(
            # Batch axis can be split across TensorCores (v7x megacore); each
            # batch owns its own output block so there is no shared-accumulator
            # race.  Pixel-tile axis is the sequential reduction axis.
            dimension_semantics=("parallel", "arbitrary"),
            vmem_limit_bytes=32 * 1024 * 1024,
        ),
    )(x, lbl)

    # Tiny final reductions over (N, 1, tile_hw) partials.
    loss_sum = jnp.sum(loss_part)
    n_valid = jnp.sum(valid_part)

    if reduction == "mean":
        # Note: if every pixel is ignore_index, this divides by zero exactly
        # like the PyTorch reference.
        return loss_sum / n_valid
    if reduction == "sum":
        return loss_sum
    # TODO(synk): reduction='none' would require returning the per-pixel loss
    # map; only 'mean'/'sum' are exposed through this partial-sum kernel.
    raise ValueError(f"unsupported reduction: {reduction}")


def _reference(logits, label, lb_smooth=0.1, ignore_index=-100):
    """Pure-JAX reference mirroring the PyTorch module (reduction='mean')."""
    logits = logits.astype(jnp.float32)
    N, C, H, W = logits.shape
    ignore = label == ignore_index
    n_valid = jnp.sum(~ignore)
    lbl = jnp.where(ignore, 0, label)
    lb_pos, lb_neg = 1.0 - lb_smooth, lb_smooth / C
    onehot = jax.nn.one_hot(lbl, C, axis=1, dtype=jnp.float32)
    smooth = onehot * lb_pos + (1.0 - onehot) * lb_neg
    logs = jax.nn.log_softmax(logits, axis=1)
    loss = -jnp.sum(logs * smooth, axis=1)
    loss = jnp.where(ignore, 0.0, loss)
    return jnp.sum(loss) / n_valid


if __name__ == "__main__":
    key = jax.random.PRNGKey(0)
    k1, k2, k3 = jax.random.split(key, 3)

    N, C, H, W = 2, 4, 16, 16
    logits = jax.random.normal(k1, (N, C, H, W), dtype=jnp.float32)
    label = jax.random.randint(k2, (N, H, W), 0, C, dtype=jnp.int32)
    # sprinkle in some ignored pixels to exercise the ignore_index path
    drop = jax.random.bernoulli(k3, 0.1, (N, H, W))
    label = jnp.where(drop, -100, label)

    out = label_smooth_softmax_ce(logits, label, lb_smooth=0.1,
                                  reduction="mean", ignore_index=-100)
    out = jax.block_until_ready(out)

    ref = _reference(logits, label, lb_smooth=0.1, ignore_index=-100)
    assert jnp.allclose(out, ref, rtol=1e-5, atol=1e-5), (out, ref)

    print("KERNEL_OK")
</pallas_src>

<mosaic_0001>
module attributes {stable_mosaic.version = 11 : i64} {
  func.func @_ls_ce_kernel(%arg0: i32, %arg1: i32, %arg2: memref<1x4x256xf32, #tpu.memory_space<vmem>>, %arg3: memref<1x1x256xi32, #tpu.memory_space<vmem>>, %arg4: memref<1x1x256xf32, #tpu.memory_space<vmem>>, %arg5: memref<1x1x256xf32, #tpu.memory_space<vmem>>) attributes {dimension_semantics = [#tpu.dimension_semantics<parallel>, #tpu.dimension_semantics<arbitrary>], iteration_bounds = array<i64: 2, 1>, scalar_prefetch = 0 : i64, scratch_operands = 0 : i64, tpu.core_type = #tpu.core_type<tc>, window_params = [{transform_indices = @transform_0, window_bounds = array<i64: 1, 4, 256>}, {transform_indices = @transform_1, window_bounds = array<i64: 1, 1, 256>}, {transform_indices = @transform_2, window_bounds = array<i64: 1, 1, 256>}, {transform_indices = @transform_3, window_bounds = array<i64: 1, 1, 256>}]} {
    %c0_i32 = arith.constant 0 : i32
    %0 = arith.cmpi eq, %arg1, %c0_i32 : i32
    %1 = arith.extui %0 : i1 to i32
    %c0_i32_0 = arith.constant 0 : i32
    %2 = arith.cmpi ne, %1, %c0_i32_0 : i32
    scf.if %2 {
      %cst_27 = arith.constant 0.000000e+00 : f32
      %58 = vector.broadcast %cst_27 : f32 to vector<1x1x256xf32>
      %c0_28 = arith.constant 0 : index
      %c0_29 = arith.constant 0 : index
      %c0_30 = arith.constant 0 : index
      %59 = vector.load %arg4[%c0_28, %c0_29, %c0_30] : memref<1x1x256xf32, #tpu.memory_space<vmem>>, vector<1x1x256xf32>
      tpu.vector_store %arg4[%c0_28, %c0_29, %c0_30], %58 {strides = array<i32>} : memref<1x1x256xf32, #tpu.memory_space<vmem>>, vector<1x1x256xf32>,
      %cst_31 = arith.constant 0.000000e+00 : f32
      %60 = vector.broadcast %cst_31 : f32 to vector<1x1x256xf32>
      %c0_32 = arith.constant 0 : index
      %c0_33 = arith.constant 0 : index
      %c0_34 = arith.constant 0 : index
      %61 = vector.load %arg5[%c0_32, %c0_33, %c0_34] : memref<1x1x256xf32, #tpu.memory_space<vmem>>, vector<1x1x256xf32>
      tpu.vector_store %arg5[%c0_32, %c0_33, %c0_34], %60 {strides = array<i32>} : memref<1x1x256xf32, #tpu.memory_space<vmem>>, vector<1x1x256xf32>,
    } else {
    }
    %c0 = arith.constant 0 : index
    %c0_1 = arith.constant 0 : index
    %c0_2 = arith.constant 0 : index
    %3 = vector.load %arg2[%c0, %c0_1, %c0_2] : memref<1x4x256xf32, #tpu.memory_space<vmem>>, vector<1x4x256xf32>
    %4 = vector.shape_cast %3 : vector<1x4x256xf32> to vector<4x256xf32>
    %c0_3 = arith.constant 0 : index
    %c0_4 = arith.constant 0 : index
    %c0_5 = arith.constant 0 : index
    %5 = vector.load %arg3[%c0_3, %c0_4, %c0_5] : memref<1x1x256xi32, #tpu.memory_space<vmem>>, vector<1x1x256xi32>
    %6 = vector.shape_cast %5 : vector<1x1x256xi32> to vector<1x256xi32>
    %7 = tpu.iota {dimensions = array<i32: 1>} : vector<1x256xi32>
    %c256_i32 = arith.constant 256 : i32
    %8 = arith.muli %arg1, %c256_i32 : i32
    %9 = vector.broadcast %8 : i32 to vector<1x256xi32>
    %10 = arith.addi %7, %9 : vector<1x256xi32>
    %c256_i32_6 = arith.constant 256 : i32
    %11 = vector.broadcast %c256_i32_6 : i32 to vector<1x256xi32>
    %12 = arith.cmpi slt, %10, %11 : vector<1x256xi32>
    %c-100_i32 = arith.constant -100 : i32
    %13 = vector.broadcast %c-100_i32 : i32 to vector<1x256xi32>
    %14 = arith.cmpi ne, %6, %13 : vector<1x256xi32>
    %15 = arith.andi %12, %14 : vector<1x256xi1>
    %cst = arith.constant dense<0xFF800000> : vector<256xf32>
    %16 = vector.multi_reduction <maximumf>, %4, %cst [0] : vector<4x256xf32> to vector<256xf32>
    %17 = vector.shape_cast %16 : vector<256xf32> to vector<1x256xf32>
    %18 = vector.broadcast %17 : vector<1x256xf32> to vector<4x256xf32>
    %19 = arith.subf %4, %18 : vector<4x256xf32>
    %20 = math.exp %19 : vector<4x256xf32>
    %cst_7 = arith.constant dense<0.000000e+00> : vector<256xf32>
    %21 = vector.multi_reduction <add>, %20, %cst_7 [0] : vector<4x256xf32> to vector<256xf32>
    %22 = vector.shape_cast %21 : vector<256xf32> to vector<1x256xf32>
    %23 = math.log %22 : vector<1x256xf32>
    %cst_8 = arith.constant dense<0.000000e+00> : vector<256xf32>
    %24 = vector.multi_reduction <add>, %19, %cst_8 [0] : vector<4x256xf32> to vector<256xf32>
    %25 = vector.shape_cast %24 : vector<256xf32> to vector<1x256xf32>
    %26 = tpu.iota {dimensions = array<i32: 0>} : vector<4x256xi32>
    %27 = vector.broadcast %6 : vector<1x256xi32> to vector<4x256xi32>
    %28 = arith.cmpi eq, %26, %27 : vector<4x256xi32>
    %cst_9 = arith.constant 0.000000e+00 : f32
    %29 = vector.broadcast %cst_9 : f32 to vector<4x256xf32>
    %30 = arith.select %28, %19, %29 : vector<4x256xi1>, vector<4x256xf32>
    %cst_10 = arith.constant dense<0.000000e+00> : vector<256xf32>
    %31 = vector.multi_reduction <add>, %30, %cst_10 [0] : vector<4x256xf32> to vector<256xf32>
    %32 = vector.shape_cast %31 : vector<256xf32> to vector<1x256xf32>
    %cst_11 = arith.constant 4.000000e+00 : f32
    %33 = vector.broadcast %cst_11 : f32 to vector<1x256xf32>
    %34 = arith.mulf %33, %23 : vector<1x256xf32>
    %35 = arith.subf %34, %25 : vector<1x256xf32>
    %cst_12 = arith.constant 2.500000e-02 : f32
    %36 = vector.broadcast %cst_12 : f32 to vector<1x256xf32>
    %37 = arith.mulf %36, %35 : vector<1x256xf32>
    %38 = arith.subf %23, %32 : vector<1x256xf32>
    %cst_13 = arith.constant 8.750000e-01 : f32
    %39 = vector.broadcast %cst_13 : f32 to vector<1x256xf32>
    %40 = arith.mulf %39, %38 : vector<1x256xf32>
    %41 = arith.addf %37, %40 : vector<1x256xf32>
    %cst_14 = arith.constant 0.000000e+00 : f32
    %42 = vector.broadcast %cst_14 : f32 to vector<1x256xf32>
    %43 = arith.select %15, %41, %42 : vector<1x256xi1>, vector<1x256xf32>
    %c0_15 = arith.constant 0 : index
    %c0_16 = arith.constant 0 : index
    %c0_17 = arith.constant 0 : index
    %44 = vector.load %arg4[%c0_15, %c0_16, %c0_17] : memref<1x1x256xf32, #tpu.memory_space<vmem>>, vector<1x1x256xf32>
    %45 = vector.shape_cast %44 : vector<1x1x256xf32> to vector<1x256xf32>
    %46 = arith.addf %45, %43 : vector<1x256xf32>
    %c0_18 = arith.constant 0 : index
    %c0_19 = arith.constant 0 : index
    %c0_20 = arith.constant 0 : index
    %47 = vector.load %arg4[%c0_18, %c0_19, %c0_20] : memref<1x1x256xf32, #tpu.memory_space<vmem>>, vector<1x1x256xf32>
    %48 = vector.shape_cast %47 : vector<1x1x256xf32> to vector<1x256xf32>
    %49 = vector.shape_cast %46 : vector<1x256xf32> to vector<1x1x256xf32>
    tpu.vector_store %arg4[%c0_18, %c0_19, %c0_20], %49 {strides = array<i32>} : memref<1x1x256xf32, #tpu.memory_space<vmem>>, vector<1x1x256xf32>,
    %c0_21 = arith.constant 0 : index
    %c0_22 = arith.constant 0 : index
    %c0_23 = arith.constant 0 : index
    %50 = vector.load %arg5[%c0_21, %c0_22, %c0_23] : memref<1x1x256xf32, #tpu.memory_space<vmem>>, vector<1x1x256xf32>
    %51 = vector.shape_cast %50 : vector<1x1x256xf32> to vector<1x256xf32>
    %52 = arith.extui %15 : vector<1x256xi1> to vector<1x256xi32>
    %53 = arith.sitofp %52 : vector<1x256xi32> to vector<1x256xf32>
    %54 = arith.addf %51, %53 : vector<1x256xf32>
    %c0_24 = arith.constant 0 : index
    %c0_25 = arith.constant 0 : index
    %c0_26 = arith.constant 0 : index
    %55 = vector.load %arg5[%c0_24, %c0_25, %c0_26] : memref<1x1x256xf32, #tpu.memory_space<vmem>>, vector<1x1x256xf32>
    %56 = vector.shape_cast %55 : vector<1x1x256xf32> to vector<1x256xf32>
    %57 = vector.shape_cast %54 : vector<1x256xf32> to vector<1x1x256xf32>
    tpu.vector_store %arg5[%c0_24, %c0_25, %c0_26], %57 {strides = array<i32>} : memref<1x1x256xf32, #tpu.memory_space<vmem>>, vector<1x1x256xf32>,
    return
  }
  func.func @transform_0(%arg0: i32, %arg1: i32) -> (i32, i32, i32) {
    %c0_i32 = arith.constant 0 : i32
    %c0_i32_0 = arith.constant 0 : i32
    return %arg0, %c0_i32, %arg1 : i32, i32, i32
  }
  func.func @transform_1(%arg0: i32, %arg1: i32) -> (i32, i32, i32) {
    %c0_i32 = arith.constant 0 : i32
    %c0_i32_0 = arith.constant 0 : i32
    return %arg0, %c0_i32, %arg1 : i32, i32, i32
  }
  func.func @transform_2(%arg0: i32, %arg1: i32) -> (i32, i32, i32) {
    %c0_i32 = arith.constant 0 : i32
    %c0_i32_0 = arith.constant 0 : i32
    %c0_i32_1 = arith.constant 0 : i32
    return %arg0, %c0_i32, %c0_i32_0 : i32, i32, i32
  }
  func.func @transform_3(%arg0: i32, %arg1: i32) -> (i32, i32, i32) {
    %c0_i32 = arith.constant 0 : i32
    %c0_i32_0 = arith.constant 0 : i32
    %c0_i32_1 = arith.constant 0 : i32
    return %arg0, %c0_i32, %c0_i32_0 : i32, i32, i32
  }
}

</mosaic_0001>

<bundles_post_ra>
// kernel: tpu_custom_call.1
= control target key start
LH: loop header
LB: loop body
LE: loop exit
PB: predicated region body
PF: predicated region fallthrough
CT: control target
= control target key end

     0   :  { %9 = vsyncpa [#allocation3], 0  ;;  %s1134_s0 = inlined_call_operand.hbm [shape: f32[2,4,256], index: 0, kind: input, shape index: {}]   ;;  %s1135_s1 = inlined_call_operand.hbm [shape: s32[2,1,256], index: 1, kind: input, shape index: {}]   ;;  %s1136_s2 = inlined_call_operand.hbm [shape: f32[2,1,256], index: 2, kind: output, shape index: {0}]   ;;  %s1137_s3 = inlined_call_operand.hbm [shape: f32[2,1,256], index: 3, kind: output, shape index: {1}]  }
   0x1   :  { %11 = vsyncpa [#allocation3 + $0x1], 0 }
   0x2   :  { %12 = vsyncpa [#allocation6], 0 }
   0x3   :  { %14 = vsyncpa [#allocation6 + $0x1], 0 }
   0x4   :  { %15 = vsyncpa [#allocation4], 0 }
   0x5   :  { %17 = vsyncpa [#allocation4 + $0x1], 0 }
   0x6   :  { %18 = vsyncpa [#allocation9], 0 }
   0x7   :  { %20 = vsyncpa [#allocation9 + $0x1], 0  ;;  %s908_s12 = smov 0   ;;  %s910_s13 = smov 0  }
   0x8   :  { %s912_s14 = smov 0   ;;  %s914_s15 = smov 0  }
   0x9   :  { %s916_s16 = smov 0   ;;  %s918_s17 = smov 0  }
   0xa LB: > { %s603_s18 = sadd.s32 4294967295, %s884_s17   ;;  %s604_s19 = sadd.s32 4294967294, %s884_s17   ;;  %s884_s17 = sphi %s918_s17, %s26_s17   ;;  %s880_s16 = sphi %s916_s16, %s1157_s16   ;;  %s876_s15 = sphi %s914_s15, %s1156_s15   ;;  %s872_s14 = sphi %s912_s14, %s1155_s14   ;;  %s868_s13 = sphi %s910_s13, %s1154_s13   ;;  %s864_s12 = sphi %s908_s12, %s1153_s12  }
   0xb   : > { %s38_s20 = sadd.s32 1, %s880_s16  ;;  %s47_s21 = sadd.s32 1, %s872_s14 }
   0xc   : > { %p40_p0 = scmp.ge.s32.totalorder %s38_s20, 2  ;;  %p54_p1 = scmp.ne.s32.totalorder %s872_s14, %s868_s13 }
   0xd   : > { %p55_p2 = scmp.eq.s32.totalorder %s884_s17, 0  ;;  %p60_p3 = scmp.ne.s32.totalorder %s868_s13, %s864_s12 }
   0xe   : > { %s1159_s20 = smov (%p40_p0, %s38_s20), 0  ;;  %p61_p5 = scmp.eq.s32.totalorder %s603_s18, 0 }
   0xf   : > { %p949_p4 = por %p55_p2, %p54_p1  ;;  %s42_s23 = ssub.s32 %s880_s16, %s1159_s20 }
  0x10   : > { %p112_p6 = scmp.eq.s32.totalorder %s603_s18, 1  ;;  %p45_p7 = scmp.eq.s32.totalorder %s42_s23, 0 }
  0x11   : > { %p955_p8 = por %p61_p5, %p60_p3  ;;  %p118_p10 = scmp.eq.s32.totalorder %s604_s19, 1 }
  0x12   : > { %p959_p9 = por %p112_p6, %p54_p1  ;;  %p606_p12 = scmp.ge.s32.totalorder %s884_s17, 2 }
  0x13   : > { %s964_s26 = scalar_select %p45_p7, %s872_s14, %s47_s21  }
  0x14   : > { %p966_p11 = por %p118_p10, %p60_p3  ;;  %p648_p13 = scmp.lt.s32.totalorder %s884_s17, 2 }
  0x15   : > { %s164_s28 = sand.u32 1, %s872_s14   ;;  %s625_s30 = sshll.u32 %s880_s16, 3 }
  0x16   : > { %s607_s29 = sshll.u32 %s164_s28, 3  ;;  %s175_s6 = scalar_lea.hbm %s1134_s0, %s625_s30 }
  0x17   : > { %s168_s7 = scalar_lea.vmem [#allocation2], %s607_s29  ;;  %s177_s9 = sshll.u32 %s175_s6, 4  ;;  %s178_s9 = int_to_ptr.hbm [resolvable:$true] %s177_s9 }
  0x18   : > { %s179_s8 = sshll.u32 %s168_s7, 4  ;;  %p979_p0 = pnand %p648_p13, %p949_p4  ;;  %s180_s8 = int_to_ptr.vmem [resolvable:$true] %s179_s8 }
  0x19   : > { %p612_p1 = scmp.ge.s32.totalorder %s884_s17, 1  ;;  %p205_p2 = scmp.lt.s32.totalorder %s884_s17, 3 }
  0x1a   : > { %s165_s11 = scalar_lea.sflag [#allocation3], %s164_s28  ;;  %s610_s18 = sshll.u32 %s164_s28, 1 }
  0x1b   : > { %637 = dma.hbm_to_vmem [thread:$0]  (!%p979_p0), %s178_s9, 128, %s180_s8, %s165_s11  }
  0x1c   : > { %p206_p3 = pnand %p612_p1, %p205_p2  ;;  %s611_s19 = sshll.u32 %s880_s16, 1 }
  0x1d   : > { %s196_s29 = scalar_lea.hbm %s1135_s1, %s611_s19  ;;  %s190_s30 = scalar_lea.vmem [#allocation5], %s610_s18 }
  0x1e   : > { %s200_s22 = sshll.u32 %s190_s30, 4  ;;  %s198_s4 = sshll.u32 %s196_s29, 4  ;;  %s201_s22 = int_to_ptr.vmem [resolvable:$true] %s200_s22  ;;  %s199_s4 = int_to_ptr.hbm [resolvable:$true] %s198_s4 }
  0x1f   : > { %s187_s5 = scalar_lea.sflag [#allocation6], %s164_s28  ;;  %209 = sbr.rel (%p206_p3) target bundleno = 130 (0x82), region = 28 }
  0x20   : > { %640 = dma.hbm_to_vmem [thread:$0]  (!%p979_p0), %s199_s4, 32, %s201_s22, %s187_s5  }
  0x21   : > { %s994_s6 = sand.u32 (!%p206_p3), 1, %s868_s13  }
  0x22   : > { %s613_s7 = sshll.u32 (!%p206_p3), %s994_s6, 3  ;;  %s212_s8 = scalar_lea.sflag (!%p206_p3), [#allocation3], %s994_s6 }
  0x23   : > { %s215_s9 = scalar_lea.vmem (!%p206_p3), [#allocation2], %s613_s7 }
  0x24   : > { %847 = dma.done.wait (%p955_p8), %s212_s8, 128  }
  0x25   : > { %849 = vsyncadd (%p955_p8), %s212_s8, 4294967168  ;;  %s1003_s28 = sshll.u32 %s994_s6, 1  ;;  %s222_s10 = scalar_lea.sflag [#allocation6], %s994_s6 }
  0x26   : > { %s225_s11 = scalar_lea.vmem [#allocation5], %s1003_s28 }
  0x27   : > { %851 = dma.done.wait (%p955_p8), %s222_s10, 32  }
  0x28   : > { %853 = vsyncadd (%p955_p8), %s222_s10, 4294967264  ;;  %v271_v0 = vld [vmem:[%s215_s9] sm:$0xff]  ;;  %vm296_vm0 = vcmask 1043456   ;;  %v265_v16 = vlaneseq  ;;  %s1019_s24 = scalar_lea.vmem [#allocation7], %s1003_s28  ;;  %v886_v21 = vmov 0.0   ;;  %s1025_s18 = scalar_lea.vmem [#allocation8], %s1003_s28 }
  0x29   : > { %291 = vst [vmem:[#allocation1] ss:$2 sm:$0xff] %v271_v0  ;;  %v272_v25 = vld [vmem:[%s225_s11] sm:$0x3]  ;;  %v887_v26 = vmov 0   ;;  %s621_s19 = sshll.u32 %s876_s15, 1 }
  0x2a   : > { %vm1013_vm1 = vcmp.lt.s32.totalorder %v265_v16, 256  ;;  %vm282_vm2 = vcmp.ne.s32.totalorder %v272_v25, 4294967196  ;;  %v364_v43 = vshrl.u32 %v265_v16, 7  ;;  %v365_v44 = vperm.slane %v272_v25, 0  ;;  %s459_s29 = scalar_lea.hbm %s1137_s3, %s621_s19  ;;  %s461_s30 = sshll.u32 %s1025_s18, 4  ;;  %s462_s30 = int_to_ptr.vmem [resolvable:$true] %s461_s30 }
  0x2b   : > { %269 = vst.msk [vmem:[%s1019_s24] sm:$0x3] %vm1013_vm1, %v886_v21  ;;  %v283_v27 = vsel %vm282_vm2, 1, %v887_v26  ;;  %vm408_vm5 = vcmask 1040384   ;;  %v366_v52 = vperm.slane %v272_v25, 1  ;;  %s463_s22 = sshll.u32 %s459_s29, 4  ;;  %s464_s22 = int_to_ptr.hbm [resolvable:$true] %s463_s22 }
  0x2c   : > { %270 = vst.msk [vmem:[%s1025_s18] sm:$0x3] %vm1013_vm1, %v886_v21  ;;  %v285_v28 = vperm.slane %v283_v27, 1  ;;  %v284_v35 = vperm.slane %v283_v27, 0  ;;  %vm1057_vm6 = vcmp.eq.s32.totalorder %v364_v43, %v365_v44  ;;  %s435_s4 = scalar_lea.sflag [#allocation9], %s994_s6  ;;  %s780_s5 = sshra.s32 %s464_s22, 4  ;;  %s781_s5 = int_to_ptr.hbm [resolvable:$true] %s780_s5 }
  0x2d   : > { %vm1061_vm7 = vcmp.eq.s32.totalorder %v364_v43, %v366_v52  ;;  %s782_s7 = scalar_lea.hbm %s781_s5, 2  ;;  %s786_s28 = scalar_lea.hbm %s1137_s3, 4 }
  0x2e   : > { %vm1034_vm3 = vcmp.ne.s32.totalorder %v285_v28, 0  ;;  %vm1039_vm4 = vcmp.ne.s32.totalorder %v284_v35, 0  ;;  %p783_p4 = scmp.ne.s32.totalorder %s781_s5, %s782_s7  ;;  %p787_p7 = scmp.lt.s32.totalorder %s781_s5, %s1137_s3 }
  0x2f   : > { %v618_v42 = vsel %vm1034_vm3, 1.0, %v886_v21  ;;  %v617_v53 = vsel %vm1039_vm4, 1.0, %v886_v21  ;;  %p788_p8 = scmp.lt.s32.totalorder %s786_s28, %s782_s7 }
  0x30   : > { %v292_v1 = vld.sshfl [vmem:[#allocation1] sm:$0xff pattern:$0x75316420]  ;;  %v293_v2 = vld.sshfl [vmem:[#allocation1 + $0x8] sm:$0xff pattern:$0x75316420]  ;;  %p784_p5 = pnand %p783_p4, %p959_p9 }
  0x31   : > { %v297_v3 = vsel %vm296_vm0, %v292_v1, -inf  ;;  %v304_v4 = vsel %vm296_vm0, %v293_v2, -inf  ;;  %v424_v45 = vrot.slane %v618_v42, 7  ;;  %p789_p10 = por %p788_p8, %p787_p7 }
  0x32   : > { %v298_v5 = vrot.slane %v297_v3, 4  ;;  %v305_v6 = vrot.slane %v304_v4, 4  ;;  %p785_p6 = pneg %p784_p5 }
  0x33   : > { %v417_v58 = vld [vmem:[%s1025_s18] sm:$0x3]  ;;  %v425_v59 = vsel %vm408_vm5, %v617_v53, %v424_v45 }
  0x34   : > { %v299_v7 = vmax.f32 %v297_v3, %v298_v5  ;;  %v306_v8 = vmax.f32 %v304_v4, %v305_v6  ;;  %p790_p13 = pnand %p789_p10, %p785_p6 }
  0x36   : > { %v300_v9 = vrot.slane %v299_v7, 2  ;;  %v307_v10 = vrot.slane %v306_v8, 2 }
  0x38   : > { %v301_v11 = vmax.f32 %v299_v7, %v300_v9  ;;  %v308_v12 = vmax.f32 %v306_v8, %v307_v10 }
  0x3a   : > { %v302_v13 = vrot.slane %v301_v11, 1  ;;  %v309_v14 = vrot.slane %v308_v12, 1 }
  0x3c   : > { %v310_v15 = vmax.f32 %v308_v12, %v309_v14  ;;  %v303_v17 = vmax.f32 %v301_v11, %v302_v13 }
  0x3e   : > { %v313_v18 = vrot.slane %v310_v15, 4 }
  0x40   : > { %v314_v20 = vsel %vm296_vm0, %v303_v17, %v313_v18 }
  0x41   : > { %v316_v22 = vsub.f32 %v271_v0, %v314_v20  ;;  %v427_v0 = vadd.f32 %v425_v59, %v417_v58 }
  0x43   : > { %v317_v23 = vmul.f32 1.442695, %v316_v22  ;;  %428 = vst.msk [vmem:[%s1025_s18] sm:$0x3] %vm1013_vm1, %v427_v0 }
  0x45   : > { %700 = vpow2.f32 %v317_v23 }
  0x4b   : > { %v701_v24 = vpop.eup %700 }
  0x4c   : > { %320 = vst [vmem:[#allocation1] ss:$2 sm:$0xff] %v701_v24 }
  0x53   : > { %v321_v29 = vld.sshfl [vmem:[#allocation1] sm:$0xff pattern:$0x75316420]  ;;  %v322_v30 = vld.sshfl [vmem:[#allocation1 + $0x8] sm:$0xff pattern:$0x75316420] }
  0x54   : > { %v325_v31 = vsel %vm296_vm0, %v321_v29, 0.0  ;;  %v332_v32 = vsel %vm296_vm0, %v322_v30, 0.0  ;;  %344 = vst [vmem:[#allocation1] ss:$2 sm:$0xff] %v316_v22 }
  0x55   : > { %v326_v33 = vrot.slane %v325_v31, 4  ;;  %v333_v34 = vrot.slane %v332_v32, 4 }
  0x57   : > { %v327_v37 = vadd.f32 %v326_v33, %v325_v31  ;;  %v334_v38 = vadd.f32 %v333_v34, %v332_v32 }
  0x59   : > { %v328_v39 = vrot.slane %v327_v37, 2  ;;  %v335_v40 = vrot.slane %v334_v38, 2 }
  0x5b   : > { %v329_v46 = vadd.f32 %v328_v39, %v327_v37  ;;  %v336_v47 = vadd.f32 %v335_v40, %v334_v38  ;;  %v345_v48 = vld.sshfl [vmem:[#allocation1] sm:$0xff pattern:$0x75316420]  ;;  %v346_v49 = vld.sshfl [vmem:[#allocation1 + $0x8] sm:$0xff pattern:$0x75316420] }
  0x5c   : > { %v349_v50 = vsel %vm296_vm0, %v345_v48, 0.0  ;;  %v356_v51 = vsel %vm296_vm0, %v346_v49, 0.0  ;;  %369 = vst [vmem:[#allocation1] ss:$2 sm:$0xff] %v316_v22 }
  0x5d   : > { %v330_v54 = vrot.slane %v329_v46, 1  ;;  %v337_v55 = vrot.slane %v336_v47, 1  ;;  %v350_v56 = vrot.slane %v349_v50, 4  ;;  %v357_v57 = vrot.slane %v356_v51, 4 }
  0x5f   : > { %v331_v60 = vadd.f32 %v330_v54, %v329_v46  ;;  %v338_v61 = vadd.f32 %v337_v55, %v336_v47  ;;  %v351_v62 = vadd.f32 %v350_v56, %v349_v50  ;;  %v358_v63 = vadd.f32 %v357_v57, %v356_v51 }
  0x61   : > { %702 = vlog2.f32 %v331_v60  ;;  %v352_v3 = vrot.slane %v351_v62, 2  ;;  %v359_v4 = vrot.slane %v358_v63, 2 }
  0x62   : > { %704 = vlog2.f32 %v338_v61 }
  0x63   : > { %v370_v5 = vld.sshfl [vmem:[#allocation1] sm:$0xff pattern:$0x75316420]  ;;  %v371_v6 = vld.sshfl [vmem:[#allocation1 + $0x8] sm:$0xff pattern:$0x75316420] }
  0x64   : > { %v374_v7 = vsel %vm1057_vm6, %v370_v5, 0.0  ;;  %v375_v8 = vsel %vm1061_vm7, %v371_v6, 0.0 }
  0x65   : > { %793 = shalt.err (!%p790_p13)
}
  0x66   : > { %631 = dma.vmem_to_hbm [thread:$0]  (%p959_p9), %s462_s30, 32, %s464_s22, %s435_s4   ;;  %v376_v9 = vsel %vm296_vm0, %v374_v7, 0.0  ;;  %v383_v10 = vsel %vm296_vm0, %v375_v8, 0.0  ;;  %v353_v11 = vadd.f32 %v352_v3, %v351_v62  ;;  %v360_v12 = vadd.f32 %v359_v4, %v358_v63  ;;  %v404_v49 = vld [vmem:[%s1019_s24] sm:$0x3] }
  0x67   : > { %v377_v13 = vrot.slane %v376_v9, 4  ;;  %v384_v14 = vrot.slane %v383_v10, 4  ;;  %v703_v15 = vpop.eup %702  ;;  %s445_s23 = scalar_lea.hbm %s1136_s2, %s621_s19  ;;  %s447_s29 = sshll.u32 %s1019_s24, 4  ;;  %s448_s29 = int_to_ptr.vmem [resolvable:$true] %s447_s29 }
  0x68   : > { %v705_v16 = vpop.eup %704  ;;  %v340_v17 = vmul.f32 0.6931472, %v703_v15  ;;  %v354_v22 = vrot.slane %v353_v11, 1  ;;  %v361_v23 = vrot.slane %v360_v12, 1  ;;  %s449_s30 = sshll.u32 %s445_s23, 4  ;;  %s430_s15 = scalar_lea.sflag [#allocation4], %s994_s6  ;;  %s450_s30 = int_to_ptr.hbm [resolvable:$true] %s449_s30 }
  0x69   : > { %v378_v18 = vadd.f32 %v377_v13, %v376_v9  ;;  %v385_v20 = vadd.f32 %v384_v14, %v383_v10  ;;  %v342_v21 = vmul.f32 0.6931472, %v705_v16  ;;  %s808_s19 = sshra.s32 %s450_s30, 4  ;;  %s814_s7 = scalar_lea.hbm %s1136_s2, 4  ;;  %s809_s19 = int_to_ptr.hbm [resolvable:$true] %s808_s19 }
  0x6a   : > { %v390_v28 = vmul.f32 4.0, %v340_v17  ;;  %v355_v30 = vadd.f32 %v354_v22, %v353_v11  ;;  %v362_v31 = vadd.f32 %v361_v23, %v360_v12  ;;  %s810_s22 = scalar_lea.hbm %s809_s19, 2  ;;  %p815_p3 = scmp.lt.s32.totalorder %s809_s19, %s1136_s2 }
  0x6b   : > { %v379_v24 = vrot.slane %v378_v18, 2  ;;  %v386_v25 = vrot.slane %v385_v20, 2  ;;  %v391_v29 = vmul.f32 4.0, %v342_v21  ;;  %p811_p0 = scmp.ne.s32.totalorder %s809_s19, %s810_s22  ;;  %p816_p4 = scmp.lt.s32.totalorder %s814_s7, %s810_s22 }
  0x6c   : > { %v392_v37 = vsub.f32 %v390_v28, %v355_v30 }
  0x6d   : > { %v380_v26 = vadd.f32 %v379_v24, %v378_v18  ;;  %v387_v27 = vadd.f32 %v386_v25, %v385_v20  ;;  %v393_v38 = vsub.f32 %v391_v29, %v362_v31  ;;  %p812_p1 = pnand %p811_p0, %p959_p9  ;;  %p817_p5 = por %p816_p4, %p815_p3 }
  0x6e   : > { %v394_v42 = vmul.f32 0.025, %v392_v37 }
  0x6f   : > { %v381_v32 = vrot.slane %v380_v26, 1  ;;  %v388_v33 = vrot.slane %v387_v27, 1  ;;  %v395_v43 = vmul.f32 0.025, %v393_v38  ;;  %p813_p2 = pneg %p812_p1 }
  0x71   : > { %v382_v34 = vadd.f32 %v381_v32, %v380_v26  ;;  %v389_v35 = vadd.f32 %v388_v33, %v387_v27  ;;  %p818_p6 = pnand %p817_p5, %p813_p2 }
  0x73   : > { %v396_v39 = vsub.f32 %v340_v17, %v382_v34  ;;  %v397_v40 = vsub.f32 %v342_v21, %v389_v35 }
  0x75   : > { %v398_v44 = vmul.f32 0.875, %v396_v39  ;;  %v399_v45 = vmul.f32 0.875, %v397_v40 }
  0x77   : > { %v400_v46 = vadd.f32 %v398_v44, %v394_v42  ;;  %v401_v47 = vadd.f32 %v399_v45, %v395_v43 }
  0x79   : > { %v403_v48 = vsel %vm1034_vm3, %v401_v47, 0.0  ;;  %v402_v51 = vsel %vm1039_vm4, %v400_v46, 0.0 }
  0x7a   : > { %v407_v50 = vrot.slane %v403_v48, 7 }
  0x7c   : > { %v409_v52 = vsel %vm408_vm5, %v402_v51, %v407_v50 }
  0x7d   : > { %v411_v53 = vadd.f32 %v409_v52, %v404_v49 }
  0x7f   : > { %416 = vst.msk [vmem:[%s1019_s24] sm:$0x3] %vm1013_vm1, %v411_v53 }
  0x80   : > { %821 = shalt.err (!%p818_p6)
}
  0x81   : > { %630 = dma.vmem_to_hbm [thread:$0]  (%p959_p9), %s448_s29, 32, %s450_s30, %s430_s15  }
  0x82 PF: > { %s475_s6 = sand.u32 1, %s864_s12   ;;  %p642_p7 = pnand %p606_p12, %p966_p11 }
  0x83   : > { %s476_s24 = scalar_lea.sflag [#allocation4], %s475_s6 }
  0x84   : > { %p643_p8 = pneg %p642_p7 }
  0x86   : > { %855 = dma.done.wait (%p643_p8), %s476_s24, 32  }
  0x87   : > { %857 = vsyncadd (%p643_p8), %s476_s24, 4294967264  ;;  %s486_s28 = scalar_lea.sflag [#allocation9], %s475_s6 }
  0x88   : > { %859 = dma.done.wait (%p643_p8), %s486_s28, 32  }
  0x89   : > { %861 = vsyncadd (%p643_p8), %s486_s28, 4294967264  ;;  %s26_s17 = sadd.s32 1, %s884_s17   ;;  %s1153_s12 = smov %s868_s13 }
  0x8a   : > { %p23_p10 = scmp.ge.s32.totalorder %s26_s17, 4   ;;  %s1154_s13 = smov %s872_s14 }
  0x8b   : > { %s1155_s14 = smov %s964_s26  ;;  %s1156_s15 = smov %s880_s16 }
  0x8c   : > { %s1157_s16 = smov %s1159_s20  ;;  %25 = sbr.rel (!%p23_p10) target bundleno = 10 (0xa), region = 107 }
  0x91   :  { %492 = vsyncpa [#allocation3], 1 }
  0x92   :  { %494 = vsyncpa [#allocation3 + $0x1], 1 }
  0x93   :  { %495 = vsyncpa [#allocation6], 1 }
  0x94   :  { %497 = vsyncpa [#allocation6 + $0x1], 1 }
  0x95   :  { %498 = vsyncpa [#allocation4], 1 }
  0x96   :  { %500 = vsyncpa [#allocation4 + $0x1], 1 }
  0x97   :  { %501 = vsyncpa [#allocation9], 1 }
  0x98   :  { %503 = vsyncpa [#allocation9 + $0x1], 1 }

</bundles_post_ra>
